<compile_context>
chip_gen: v7x
topology: tpu7x:2x2x1
jax: 0.10.0
libtpu: 0.0.40
codegen_flags: <defaults>
</compile_context>

<pallas_src>
import jax
import jax.numpy as jnp
from jax.experimental import pallas as pl
from jax.experimental.pallas import tpu as pltpu

_NEG_BIG = -1e30  # bias for padded output columns -> exp() underflows to 0


def _softmax_mlp_kernel(x_ref, w1_ref, b1_ref, w2_ref, b2_ref, w3_ref, b3_ref,
                        o_ref):
    x = x_ref[...]
    # lin1 + ReLU  (MXU matmul, f32 accumulate; elementwise in f32 on the VPU)
    h1 = jnp.dot(x, w1_ref[...], preferred_element_type=jnp.float32) + b1_ref[...]
    h1 = jnp.maximum(h1, 0.0)
    # lin2 + ReLU
    h2 = jnp.dot(h1, w2_ref[...], preferred_element_type=jnp.float32) + b2_ref[...]
    h2 = jnp.maximum(h2, 0.0)
    # lin3 (output dim is padded to a 128-lane multiple; padded columns carry a
    # -1e30 bias so they contribute exactly 0 to the softmax)
    z = jnp.dot(h2, w3_ref[...], preferred_element_type=jnp.float32) + b3_ref[...]
    # row-wise softmax over the last (lane) axis
    z_max = jnp.max(z, axis=-1, keepdims=True)      # XLU reduce
    e = jnp.exp(z - z_max)                           # EUP
    denom = jnp.sum(e, axis=-1, keepdims=True)       # XLU reduce
    o_ref[...] = (e / denom).astype(o_ref.dtype)


def softmax_model_forward(x, w1, b1, w2, b2, w3, b3, *, block_b=512):
    """x: [B, num_in] f32 -> [B, num_out] f32 (rows sum to 1)."""
    B, num_in = x.shape
    num_hidden = w1.shape[1]
    num_out = w3.shape[1]

    # Pad the output feature dim to a multiple of 128 so the final store is
    # lane-dense (unmasked vst); slice the real columns off after the call.
    out_pad = ((num_out + 127) // 128) * 128
    pad_n = out_pad - num_out
    w3p = jnp.pad(w3, ((0, 0), (0, pad_n)))
    b3p = jnp.pad(b3, ((0, 0), (0, pad_n)), constant_values=_NEG_BIG)

    vmem_spec = pl.BlockSpec(memory_space=pltpu.MemorySpace.VMEM)

    if B <= block_b:
        # Small batch: no grid, everything VMEM-resident, single kernel body run.
        out = pl.pallas_call(
            _softmax_mlp_kernel,
            out_shape=jax.ShapeDtypeStruct((B, out_pad), jnp.float32),
            in_specs=[vmem_spec] * 7,
            out_specs=vmem_spec,
        )(x, w1, b1, w2, b2, w3p, b3p)
        return out[:, :num_out]

    # Large batch: tile the (independent) batch axis; weights/biases stay
    # resident (index_map -> (0, 0)); mark the axis "parallel" so it can be
    # sharded across TensorCores (v7x megacore).
    nb = pl.cdiv(B, block_b)
    bp = nb * block_b
    if bp != B:
        x = jnp.pad(x, ((0, bp - B), (0, 0)))

    out = pl.pallas_call(
        _softmax_mlp_kernel,
        out_shape=jax.ShapeDtypeStruct((bp, out_pad), jnp.float32),
        grid_spec=pltpu.PrefetchScalarGridSpec(
            num_scalar_prefetch=0,
            grid=(nb,),
            in_specs=[
                pl.BlockSpec((block_b, num_in), lambda i: (i, 0)),
                pl.BlockSpec((num_in, num_hidden), lambda i: (0, 0)),
                pl.BlockSpec((1, num_hidden), lambda i: (0, 0)),
                pl.BlockSpec((num_hidden, num_hidden), lambda i: (0, 0)),
                pl.BlockSpec((1, num_hidden), lambda i: (0, 0)),
                pl.BlockSpec((num_hidden, out_pad), lambda i: (0, 0)),
                pl.BlockSpec((1, out_pad), lambda i: (0, 0)),
            ],
            out_specs=pl.BlockSpec((block_b, out_pad), lambda i: (i, 0)),
        ),
        compiler_params=pltpu.CompilerParams(
            dimension_semantics=("parallel",)),
    )(x, w1, b1, w2, b2, w3p, b3p)
    return out[:B, :num_out]


def init_params(key, num_in, num_hidden, num_out):
    """Deterministic init mimicking nn.Linear's U(-1/sqrt(fan_in), +1/sqrt(fan_in))."""
    ks = jax.random.split(key, 6)

    def _layer(kw, kb, fan_in, fan_out):
        bound = 1.0 / jnp.sqrt(fan_in)
        w = jax.random.uniform(kw, (fan_in, fan_out), jnp.float32, -bound, bound)
        b = jax.random.uniform(kb, (1, fan_out), jnp.float32, -bound, bound)
        return w, b

    w1, b1 = _layer(ks[0], ks[1], num_in, num_hidden)
    w2, b2 = _layer(ks[2], ks[3], num_hidden, num_hidden)
    w3, b3 = _layer(ks[4], ks[5], num_hidden, num_out)
    return w1, b1, w2, b2, w3, b3


def reference_forward(x, w1, b1, w2, b2, w3, b3):
    hp = jax.lax.Precision.HIGHEST
    h1 = jnp.maximum(jnp.dot(x, w1, precision=hp) + b1, 0.0)
    h2 = jnp.maximum(jnp.dot(h1, w2, precision=hp) + b2, 0.0)
    z = jnp.dot(h2, w3, precision=hp) + b3
    return jax.nn.softmax(z, axis=1)


if __name__ == "__main__":
    # Small shapes consistent with the module's forward: [batch, num_in].
    B, NUM_IN, NUM_HIDDEN, NUM_OUT = 8, 32, 128, 10

    key = jax.random.PRNGKey(0)
    kx, kp, kx2 = jax.random.split(key, 3)
    x = jax.random.normal(kx, (B, NUM_IN), jnp.float32)
    params = init_params(kp, NUM_IN, NUM_HIDDEN, NUM_OUT)

    # Grid-less (small-batch) path.
    out = jax.block_until_ready(softmax_model_forward(x, *params))
    ref = reference_forward(x, *params)
    assert out.shape == (B, NUM_OUT)
    assert jnp.allclose(out, ref, atol=1e-4, rtol=1e-4)
    assert jnp.allclose(out.sum(axis=1), 1.0, atol=1e-5)

    # Batch-tiled ("parallel" grid) path with a non-divisible batch.
    B2 = 520
    x2 = jax.random.normal(kx2, (B2, NUM_IN), jnp.float32)
    out2 = jax.block_until_ready(softmax_model_forward(x2, *params, block_b=256))
    ref2 = reference_forward(x2, *params)
    assert out2.shape == (B2, NUM_OUT)
    assert jnp.allclose(out2, ref2, atol=1e-4, rtol=1e-4)

    print("KERNEL_OK")
</pallas_src>

<mosaic_0001>
module attributes {stable_mosaic.version = 11 : i64} {
  func.func @_softmax_mlp_kernel(%arg0: memref<8x32xf32, #tpu.memory_space<vmem>>, %arg1: memref<32x128xf32, #tpu.memory_space<vmem>>, %arg2: memref<1x128xf32, #tpu.memory_space<vmem>>, %arg3: memref<128x128xf32, #tpu.memory_space<vmem>>, %arg4: memref<1x128xf32, #tpu.memory_space<vmem>>, %arg5: memref<128x128xf32, #tpu.memory_space<vmem>>, %arg6: memref<1x128xf32, #tpu.memory_space<vmem>>, %arg7: memref<8x128xf32, #tpu.memory_space<vmem>>) attributes {dimension_semantics = [], scalar_prefetch = 0 : i64, scratch_operands = 0 : i64, tpu.core_type = #tpu.core_type<tc>} {
    %c0 = arith.constant 0 : index
    %c0_0 = arith.constant 0 : index
    %0 = vector.load %arg0[%c0, %c0_0] : memref<8x32xf32, #tpu.memory_space<vmem>>, vector<8x32xf32>
    %c0_1 = arith.constant 0 : index
    %c0_2 = arith.constant 0 : index
    %1 = vector.load %arg1[%c0_1, %c0_2] : memref<32x128xf32, #tpu.memory_space<vmem>>, vector<32x128xf32>
    %cst = arith.constant dense<0.000000e+00> : vector<8x128xf32>
    %2 = tpu.matmul %0, %1, %cst {dimension_numbers = #tpu.dot_dimension_numbers<[1], [0], [0], [1], [0, 0, 1, 1], [], []>} : vector<8x32xf32>, vector<32x128xf32>, vector<8x128xf32> -> vector<8x128xf32>
    %c0_3 = arith.constant 0 : index
    %c0_4 = arith.constant 0 : index
    %3 = vector.load %arg2[%c0_3, %c0_4] : memref<1x128xf32, #tpu.memory_space<vmem>>, vector<1x128xf32>
    %4 = vector.broadcast %3 : vector<1x128xf32> to vector<8x128xf32>
    %5 = arith.addf %2, %4 : vector<8x128xf32>
    %cst_5 = arith.constant 0.000000e+00 : f32
    %6 = vector.broadcast %cst_5 : f32 to vector<8x128xf32>
    %7 = arith.maximumf %5, %6 : vector<8x128xf32>
    %c0_6 = arith.constant 0 : index
    %c0_7 = arith.constant 0 : index
    %8 = vector.load %arg3[%c0_6, %c0_7] : memref<128x128xf32, #tpu.memory_space<vmem>>, vector<128x128xf32>
    %cst_8 = arith.constant dense<0.000000e+00> : vector<8x128xf32>
    %9 = tpu.matmul %7, %8, %cst_8 {dimension_numbers = #tpu.dot_dimension_numbers<[1], [0], [0], [1], [0, 0, 1, 1], [], []>} : vector<8x128xf32>, vector<128x128xf32>, vector<8x128xf32> -> vector<8x128xf32>
    %c0_9 = arith.constant 0 : index
    %c0_10 = arith.constant 0 : index
    %10 = vector.load %arg4[%c0_9, %c0_10] : memref<1x128xf32, #tpu.memory_space<vmem>>, vector<1x128xf32>
    %11 = vector.broadcast %10 : vector<1x128xf32> to vector<8x128xf32>
    %12 = arith.addf %9, %11 : vector<8x128xf32>
    %cst_11 = arith.constant 0.000000e+00 : f32
    %13 = vector.broadcast %cst_11 : f32 to vector<8x128xf32>
    %14 = arith.maximumf %12, %13 : vector<8x128xf32>
    %c0_12 = arith.constant 0 : index
    %c0_13 = arith.constant 0 : index
    %15 = vector.load %arg5[%c0_12, %c0_13] : memref<128x128xf32, #tpu.memory_space<vmem>>, vector<128x128xf32>
    %cst_14 = arith.constant dense<0.000000e+00> : vector<8x128xf32>
    %16 = tpu.matmul %14, %15, %cst_14 {dimension_numbers = #tpu.dot_dimension_numbers<[1], [0], [0], [1], [0, 0, 1, 1], [], []>} : vector<8x128xf32>, vector<128x128xf32>, vector<8x128xf32> -> vector<8x128xf32>
    %c0_15 = arith.constant 0 : index
    %c0_16 = arith.constant 0 : index
    %17 = vector.load %arg6[%c0_15, %c0_16] : memref<1x128xf32, #tpu.memory_space<vmem>>, vector<1x128xf32>
    %18 = vector.broadcast %17 : vector<1x128xf32> to vector<8x128xf32>
    %19 = arith.addf %16, %18 : vector<8x128xf32>
    %cst_17 = arith.constant dense<0xFF800000> : vector<8xf32>
    %20 = vector.multi_reduction <maximumf>, %19, %cst_17 [1] : vector<8x128xf32> to vector<8xf32>
    %21 = vector.shape_cast %20 : vector<8xf32> to vector<8x1xf32>
    %22 = vector.broadcast %21 : vector<8x1xf32> to vector<8x128xf32>
    %23 = arith.subf %19, %22 : vector<8x128xf32>
    %24 = math.exp %23 : vector<8x128xf32>
    %cst_18 = arith.constant dense<0.000000e+00> : vector<8xf32>
    %25 = vector.multi_reduction <add>, %24, %cst_18 [1] : vector<8x128xf32> to vector<8xf32>
    %26 = vector.shape_cast %25 : vector<8xf32> to vector<8x1xf32>
    %27 = vector.broadcast %26 : vector<8x1xf32> to vector<8x128xf32>
    %28 = arith.divf %24, %27 : vector<8x128xf32>
    %c0_19 = arith.constant 0 : index
    %c0_20 = arith.constant 0 : index
    %29 = vector.load %arg7[%c0_19, %c0_20] : memref<8x128xf32, #tpu.memory_space<vmem>>, vector<8x128xf32>
    tpu.vector_store %arg7[%c0_19, %c0_20], %28 {strides = array<i32>} : memref<8x128xf32, #tpu.memory_space<vmem>>, vector<8x128xf32>,
    return
  }
}

</mosaic_0001>

<bundles_post_ra>
// kernel: tpu_custom_call.1
= control target key start
LH: loop header
LB: loop body
LE: loop exit
PB: predicated region body
PF: predicated region fallthrough
CT: control target
= control target key end

     0   :  { %12 = vsyncpa [#allocation3], 0  ;;  %s840_s0 = inlined_call_operand.hbm [shape: f32[8,32], index: 0, kind: input, shape index: {}]   ;;  %s841_s1 = inlined_call_operand.hbm [shape: f32[32,128], index: 1, kind: input, shape index: {}]   ;;  %s842_s2 = inlined_call_operand.vmem [shape: f32[1,128], index: 2, kind: input, shape index: {}]   ;;  %s843_s3 = inlined_call_operand.hbm [shape: f32[128,128], index: 3, kind: input, shape index: {}]   ;;  %s844_s4 = inlined_call_operand.vmem [shape: f32[1,128], index: 4, kind: input, shape index: {}]   ;;  %s845_s5 = inlined_call_operand.hbm [shape: f32[128,128], index: 5, kind: input, shape index: {}]   ;;  %s846_s6 = inlined_call_operand.vmem [shape: f32[1,128], index: 6, kind: input, shape index: {}]   ;;  %s847_s7 = inlined_call_operand.hbm [shape: f32[8,128], index: 7, kind: output, shape index: {}]  }
   0x1   :  { %13 = vsyncpa [#allocation6], 0 }
   0x2   :  { %14 = vsyncpa [#allocation9], 0 }
   0x3   :  { %15 = vsyncpa [#allocation4], 0  ;;  %s691_s24 = smov [#allocation5]   ;;  %s573_s28 = scalar_lea.hbm %s841_s1, 512 }
   0x4   :  { %s31_s25 = sshll.u32 %s691_s24, 4  ;;  %p574_p0 = scmp.ne.s32.totalorder %s841_s1, %s573_s28  ;;  %s32_s25 = int_to_ptr.vmem [resolvable:$true] %s31_s25 }
   0x5   :  { %p577_p1 = scmp.lt.u32.totalorder %s573_s28, %s841_s1 }
   0x7   :  { %p579_p2 = pnand %p577_p1, %p574_p0 }
   0x9   :  { %582 = shalt.err (!%p579_p2)
}
   0xa   :  { %s583_s10 = scalar_lea.vmem %s32_s25, 512  ;;  %p588_p4 = scmp.lt.s32.totalorder %s32_s25, %s32_s25 }
   0xb   :  { %p584_p3 = scmp.ne.s32.totalorder %s32_s25, %s583_s10  ;;  %p589_p5 = scmp.lt.s32.totalorder %s583_s10, %s583_s10 }
   0xd   :  { %p590_p6 = por %p589_p5, %p588_p4 }
   0xf   :  { %p591_p7 = pnand %p590_p6, %p584_p3 }
  0x11   :  { %594 = shalt.err (!%p591_p7)
}
  0x12   :  { %s692_s11 = smov 128   ;;  %s693_s12 = smov 8  }
  0x13   :  { %37 = dma.hbm_to_vmem [thread:$0]  %s841_s1, 512, %s32_s25, [#allocation6], %s692_s11, %s692_s11, %s693_s12  }
  0x14   :  { %s694_s15 = smov [#allocation2]   ;;  %s695_s17 = smov [#allocation7]  }
  0x15   :  { %s22_s16 = sshll.u32 %s694_s15, 4  ;;  %s45_s18 = sshll.u32 %s695_s17, 4  ;;  %s23_s16 = int_to_ptr.vmem [resolvable:$true] %s22_s16  ;;  %s46_s18 = int_to_ptr.vmem [resolvable:$true] %s45_s18 }
  0x16   :  { %s595_s21 = scalar_lea.hbm %s840_s0, 128 }
  0x17   :  { %p596_p8 = scmp.ne.s32.totalorder %s840_s0, %s595_s21  ;;  %p599_p9 = scmp.lt.u32.totalorder %s595_s21, %s840_s0 }
  0x19   :  { %p601_p10 = pnand %p599_p9, %p596_p8 }
  0x1b   :  { %604 = shalt.err (!%p601_p10)
}
  0x1c   :  { %s605_s1 = scalar_lea.vmem %s23_s16, 128  ;;  %p610_p12 = scmp.lt.s32.totalorder %s23_s16, %s23_s16 }
  0x1d   :  { %p606_p11 = scmp.ne.s32.totalorder %s23_s16, %s605_s1  ;;  %p611_p13 = scmp.lt.s32.totalorder %s605_s1, %s605_s1 }
  0x1f   :  { %p612_p0 = por %p611_p13, %p610_p12 }
  0x21   :  { %p613_p1 = pnand %p612_p0, %p606_p11 }
  0x23   :  { %616 = shalt.err (!%p613_p1)
}
  0x24   :  { %25 = dma.hbm_to_vmem [thread:$0]  %s840_s0, 128, %s23_s16, [#allocation3]  }
  0x25   :  { %s617_s30 = scalar_lea.hbm %s843_s3, 2048 }
  0x26   :  { %p618_p2 = scmp.ne.s32.totalorder %s843_s3, %s617_s30  ;;  %p621_p3 = scmp.lt.u32.totalorder %s617_s30, %s843_s3 }
  0x28   :  { %p623_p4 = pnand %p621_p3, %p618_p2 }
  0x2a   :  { %626 = shalt.err (!%p623_p4)
}
  0x2b   :  { %s627_s14 = scalar_lea.vmem %s46_s18, 2048  ;;  %p632_p6 = scmp.lt.s32.totalorder %s46_s18, %s46_s18 }
  0x2c   :  { %p628_p5 = scmp.ne.s32.totalorder %s46_s18, %s627_s14  ;;  %p633_p7 = scmp.lt.s32.totalorder %s627_s14, %s627_s14 }
  0x2e   :  { %p634_p8 = por %p633_p7, %p632_p6 }
  0x30   :  { %p635_p9 = pnand %p634_p8, %p628_p5 }
  0x32   :  { %638 = shalt.err (!%p635_p9)
}
  0x33   :  { %51 = dma.hbm_to_vmem [thread:$0]  %s843_s3, 2048, %s46_s18, [#allocation6], %s692_s11, %s692_s11, %s693_s12  }
  0x34   :  { %s696_s16 = smov [#allocation8]   ;;  %s639_s21 = scalar_lea.hbm %s845_s5, 2048 }
  0x35   :  { %s59_s17 = sshll.u32 %s696_s16, 4  ;;  %p640_p10 = scmp.ne.s32.totalorder %s845_s5, %s639_s21  ;;  %s60_s17 = int_to_ptr.vmem [resolvable:$true] %s59_s17 }
  0x36   :  { %p643_p11 = scmp.lt.u32.totalorder %s639_s21, %s845_s5 }
  0x38   :  { %p645_p12 = pnand %p643_p11, %p640_p10 }
  0x3a   :  { %648 = shalt.err (!%p645_p12)
}
  0x3b   :  { %s649_s1 = scalar_lea.vmem %s60_s17, 2048  ;;  %p654_p0 = scmp.lt.s32.totalorder %s60_s17, %s60_s17 }
  0x3c   :  { %p650_p13 = scmp.ne.s32.totalorder %s60_s17, %s649_s1  ;;  %p655_p1 = scmp.lt.s32.totalorder %s649_s1, %s649_s1 }
  0x3e   :  { %p656_p2 = por %p655_p1, %p654_p0 }
  0x40   :  { %p657_p3 = pnand %p656_p2, %p650_p13 }
  0x42   :  { %660 = shalt.err (!%p657_p3)
}
  0x43   :  { %65 = dma.hbm_to_vmem [thread:$0]  %s845_s5, 2048, %s60_s17, [#allocation9], %s692_s11, %s692_s11, %s693_s12  }
  0x44   :  { %683 = dma.done.wait [#allocation3], 128  }
  0x45   :  { %684 = vsyncadd [#allocation3], 4294967168 }
  0x46   :  { %685 = dma.done.wait [#allocation6], 2560  }
  0x47   :  { %686 = vsyncadd [#allocation6], 4294964736 }
  0x48   :  { %687 = dma.done.wait [#allocation9], 2048  }
  0x49   :  { %688 = vsyncadd [#allocation9], 4294965248  ;;  %v697_v0 = vmov 0.0|0.0   ;;  %vm698_vm0 = vmmov 0   ;;  %v699_v1 = vmov 0.0   ;;  %v81_v2 = vld [vmem:[#allocation5] sm:$0xff] }
  0x4a   :  { %505 = vmatprep.subr.bf16.mxu0 %v697_v0  ;;  %432 = vmatprep.mubr.msk.f32.mxu0 %vm698_vm0, %v699_v1  ;;  %v82_v3 = vld [vmem:[#allocation5 + $0x8] sm:$0xff]  ;;  %v83_v4 = vld [vmem:[#allocation5 + $0x10] sm:$0xff]  ;;  %v84_v6 = vld [vmem:[#allocation5 + $0x18] sm:$0xff]  ;;  %vm92_vm1 = vcmask 261120  }
  0x4b   :  { %511 = vmatprep.subr.bf16.mxu1 %v697_v0  ;;  %467 = vmatprep.mubr.msk.f32.mxu1 %vm698_vm0, %v699_v1  ;;  %v506_v5 = vpack.c.bf16 %v82_v3, %v81_v2  ;;  %v167_v7 = vld [vmem:[#allocation7] sm:$0xff]  ;;  %v168_v8 = vld [vmem:[#allocation7 + $0x8] sm:$0xff]  ;;  %v169_v9 = vld [vmem:[#allocation7 + $0x10] sm:$0xff]  ;;  %v509_v11 = vpack.c.bf16 %v84_v6, %v83_v4 }
  0x4c   :  { %v170_v10 = vld [vmem:[#allocation7 + $0x18] sm:$0xff]  ;;  %v512_v12 = vpack.c.bf16 %v168_v8, %v167_v7  ;;  %v171_v14 = vld [vmem:[#allocation7 + $0x20] sm:$0xff]  ;;  %v172_v15 = vld [vmem:[#allocation7 + $0x28] sm:$0xff] }
  0x4d   :  { %507 = vmatpush3.bf16.msra.mxu0 %v506_v5  ;;  %v515_v13 = vpack.c.bf16 %v170_v10, %v169_v9  ;;  %v80_v16 = vld [vmem:[#allocation2] sm:$0xff]  ;;  %v518_v17 = vpack.c.bf16 %v172_v15, %v171_v14  ;;  %v173_v18 = vld [vmem:[#allocation7 + $0x30] sm:$0xff]  ;;  %v175_v21 = vld [vmem:[#allocation7 + $0x40] sm:$0xff] }
  0x4e   :  { %508 = vmatprep.subr.bf16.mxu0 %v697_v0  ;;  %513 = vmatpush3.bf16.msra.mxu1 %v512_v12  ;;  %v174_v19 = vld [vmem:[#allocation7 + $0x38] sm:$0xff]  ;;  %v176_v22 = vld [vmem:[#allocation7 + $0x48] sm:$0xff]  ;;  %v177_v24 = vld [vmem:[#allocation7 + $0x50] sm:$0xff] }
  0x4f   :  { %514 = vmatprep.subr.bf16.mxu1 %v697_v0  ;;  %v521_v20 = vpack.c.bf16 %v174_v19, %v173_v18  ;;  %v524_v23 = vpack.c.bf16 %v176_v22, %v175_v21  ;;  %v178_v25 = vld [vmem:[#allocation7 + $0x58] sm:$0xff]  ;;  %v179_v27 = vld [vmem:[#allocation7 + $0x60] sm:$0xff]  ;;  %v180_v28 = vld [vmem:[#allocation7 + $0x68] sm:$0xff] }
  0x50   :  { %v527_v26 = vpack.c.bf16 %v178_v25, %v177_v24  ;;  %v530_v29 = vpack.c.bf16 %v180_v28, %v179_v27  ;;  %v181_v30 = vld [vmem:[#allocation7 + $0x70] sm:$0xff]  ;;  %v182_v31 = vld [vmem:[#allocation7 + $0x78] sm:$0xff]  ;;  %v261_v33 = vld [vmem:[#allocation8] sm:$0xff] }
  0x51   :  { %510 = vmatpush3.bf16.msra.mxu0 %v509_v11  ;;  %v533_v32 = vpack.c.bf16 %v182_v31, %v181_v30  ;;  %v262_v34 = vld [vmem:[#allocation8 + $0x8] sm:$0xff]  ;;  %v263_v35 = vld [vmem:[#allocation8 + $0x10] sm:$0xff]  ;;  %v264_v37 = vld [vmem:[#allocation8 + $0x18] sm:$0xff] }
  0x52   :  { %535 = vmatprep.subr.bf16.mxu0 %v697_v0  ;;  %516 = vmatpush3.bf16.msra.mxu1 %v515_v13  ;;  %v536_v36 = vpack.c.bf16 %v262_v34, %v261_v33  ;;  %v539_v38 = vpack.c.bf16 %v264_v37, %v263_v35  ;;  %v265_v39 = vld [vmem:[#allocation8 + $0x20] sm:$0xff]  ;;  %v266_v40 = vld [vmem:[#allocation8 + $0x28] sm:$0xff]  ;;  %v267_v42 = vld [vmem:[#allocation8 + $0x30] sm:$0xff] }
  0x53   :  { %517 = vmatprep.subr.bf16.mxu1 %v697_v0  ;;  %v542_v41 = vpack.c.bf16 %v266_v40, %v265_v39  ;;  %v268_v43 = vld [vmem:[#allocation8 + $0x38] sm:$0xff]  ;;  %v269_v45 = vld [vmem:[#allocation8 + $0x40] sm:$0xff]  ;;  %v270_v46 = vld [vmem:[#allocation8 + $0x48] sm:$0xff] }
  0x54   :  { %433 = vmatmul.mubr.msk.f32.vlgmr.msra.gmra.mrb[0].mxu0 %vm92_vm1, %v80_v16  ;;  %v545_v44 = vpack.c.bf16 %v268_v43, %v267_v42  ;;  %v548_v47 = vpack.c.bf16 %v270_v46, %v269_v45  ;;  %v271_v48 = vld [vmem:[#allocation8 + $0x50] sm:$0xff]  ;;  %v272_v49 = vld [vmem:[#allocation8 + $0x58] sm:$0xff]  ;;  %v273_v51 = vld [vmem:[#allocation8 + $0x60] sm:$0xff] }
  0x55   :  { %502 = vmatprep.mubr.msk.f32.mxu0 %vm698_vm0, %v699_v1  ;;  %537 = vmatpush3.bf16.msra.mxu0 %v536_v36  ;;  %v551_v50 = vpack.c.bf16 %v272_v49, %v271_v48  ;;  %v274_v52 = vld [vmem:[#allocation8 + $0x68] sm:$0xff]  ;;  %v381_v54 = vld [vmem:[%s842_s2] ss:$0 sm:$0xff]  ;;  %v275_v59 = vld [vmem:[#allocation8 + $0x70] sm:$0xff] }
  0x56   :  { %519 = vmatpush3.bf16.msra.mxu1 %v518_v17  ;;  %538 = vmatprep.subr.bf16.mxu0 %v697_v0  ;;  %v554_v53 = vpack.c.bf16 %v274_v52, %v273_v51  ;;  %v276_v60 = vld [vmem:[#allocation8 + $0x78] sm:$0xff] }
  0x57   :  { %520 = vmatprep.subr.bf16.mxu1 %v697_v0  ;;  %v557_v61 = vpack.c.bf16 %v276_v60, %v275_v59  ;;  %v383_v62 = vld [vmem:[%s844_s4] ss:$0 sm:$0xff]  ;;  %s700_s4 = smov [#allocation10]  }
  0x58   :  { %v384_v3 = vld [vmem:[%s846_s6] ss:$0 sm:$0xff]  ;;  %s370_s28 = sshll.u32 %s700_s4, 4  ;;  %s371_s28 = int_to_ptr.vmem [resolvable:$true] %s370_s28 }
  0x59   :  { %540 = vmatpush3.bf16.msra.mxu0 %v539_v38  ;;  %s661_s29 = scalar_lea.vmem %s371_s28, 128  ;;  %p666_p5 = scmp.lt.s32.totalorder %s371_s28, %s371_s28 }
  0x5a   :  { %522 = vmatpush3.bf16.msra.mxu1 %v521_v20  ;;  %541 = vmatprep.subr.bf16.mxu0 %v697_v0  ;;  %p662_p4 = scmp.ne.s32.totalorder %s371_s28, %s661_s29  ;;  %p667_p6 = scmp.lt.s32.totalorder %s661_s29, %s661_s29 }
  0x5b   :  { %523 = vmatprep.subr.bf16.mxu1 %v697_v0 }
  0x5c   :  { %p668_p7 = por %p667_p6, %p666_p5 }
  0x5d   :  { %543 = vmatpush3.bf16.msra.mxu0 %v542_v41 }
  0x5e   :  { %525 = vmatpush3.bf16.msra.mxu1 %v524_v23  ;;  %544 = vmatprep.subr.bf16.mxu0 %v697_v0  ;;  %p669_p8 = pnand %p668_p7, %p662_p4 }
  0x5f   :  { %526 = vmatprep.subr.bf16.mxu1 %v697_v0 }
  0x61   :  { %546 = vmatpush3.bf16.msra.mxu0 %v545_v44 }
  0x62   :  { %528 = vmatpush3.bf16.msra.mxu1 %v527_v26  ;;  %547 = vmatprep.subr.bf16.mxu0 %v697_v0 }
  0x63   :  { %529 = vmatprep.subr.bf16.mxu1 %v697_v0 }
  0x65   :  { %549 = vmatpush3.bf16.msra.mxu0 %v548_v47 }
  0x66   :  { %531 = vmatpush3.bf16.msra.mxu1 %v530_v29  ;;  %550 = vmatprep.subr.bf16.mxu0 %v697_v0 }
  0x67   :  { %532 = vmatprep.subr.bf16.mxu1 %v697_v0 }
  0x69   :  { %552 = vmatpush3.bf16.msra.mxu0 %v551_v50 }
  0x6a   :  { %534 = vmatpush3.bf16.msra.mxu1 %v533_v32  ;;  %553 = vmatprep.subr.bf16.mxu0 %v697_v0 }
  0x6d   :  { %555 = vmatpush3.bf16.msra.mxu0 %v554_v53 }
  0x6e   :  { %556 = vmatprep.subr.bf16.mxu0 %v697_v0 }
  0x71   :  { %558 = vmatpush3.bf16.msra.mxu0 %v557_v61 }
 0x127   :  { %v162_v55 = vpop.f32.mrb[0].mxu0 }
 0x128   :  { %v163_v56 = vadd.f32 %v381_v54, %v162_v55  ;;  %v434_v57 = vpop.f32.mrb[1].mxu0 }
 0x12a   :  { %v166_v58 = vmax.f32 %v163_v56, 0.0 }
 0x12c   :  { %468 = vmatmul.mubr.f32.vlgmr.msra.gmra.mrb[0].mxu1 %v166_v58 }
 0x1ff   :  { %v256_v63 = vpop.f32.mrb[0].mxu1 }
 0x200   :  { %v257_v1 = vadd.f32 %v383_v62, %v256_v63  ;;  %v469_v0 = vpop.f32.mrb[1].mxu1 }
 0x202   :  { %v260_v2 = vmax.f32 %v257_v1, 0.0 }
 0x204   :  { %503 = vmatmul.mubr.f32.vlgmr.msra.gmra.mrb[2].mxu0 %v260_v2 }
 0x2d7   :  { %v350_v4 = vpop.f32.mrb[2].mxu0 }
 0x2d8   :  { %v351_v5 = vadd.f32 %v384_v3, %v350_v4  ;;  %v504_v6 = vpop.f32.mrb[3].mxu0 }
 0x2da   :  { %354 = vmax.xlane.f32.xlu0 %v351_v5 }
 0x367   :  { %v355_v7 = vpop.xlane.xlu0 %354 }
 0x368   :  { %v356_v8 = vsub.f32 %v351_v5, %v355_v7 }
 0x36a   :  { %v357_v9 = vmul.f32 1.442695, %v356_v8 }
 0x36c   :  { %569 = vpow2.f32 %v357_v9 }
 0x376   :  { %v570_v10 = vpop.eup %569 }
 0x377   :  { %359 = vadd.xlane.f32.xlu0 %v570_v10 }
 0x404   :  { %v360_v11 = vpop.xlane.xlu0 %359 }
 0x405   :  { %571 = vrcp.f32 %v360_v11 }
 0x40f   :  { %v572_v12 = vpop.eup %571 }
 0x410   :  { %v362_v13 = vmul.f32 %v572_v12, %v570_v10 }
 0x412   :  { %363 = vst [vmem:[#allocation10] sm:$0xff] %v362_v13 }
 0x413   :  { %672 = shalt.err (!%p669_p8)
}
 0x414   :  { %s673_s8 = scalar_lea.hbm %s847_s7, 128 }
 0x415   :  { %p674_p9 = scmp.ne.s32.totalorder %s847_s7, %s673_s8  ;;  %p677_p10 = scmp.lt.u32.totalorder %s673_s8, %s847_s7 }
 0x417   :  { %p679_p11 = pnand %p677_p10, %p674_p9 }
 0x419   :  { %682 = shalt.err (!%p679_p11)
}
 0x41a   :  { %373 = dma.vmem_to_hbm [thread:$0]  %s371_s28, 128, %s847_s7, [#allocation4]  }
 0x41b   :  { %689 = dma.done.wait [#allocation4], 128  }
 0x41c   :  { %690 = vsyncadd [#allocation4], 4294967168 }
 0x41d   :  { %377 = vsyncpa [#allocation3], 1 }
 0x41e   :  { %378 = vsyncpa [#allocation6], 1 }
 0x41f   :  { %379 = vsyncpa [#allocation9], 1 }
 0x420   :  { %380 = vsyncpa [#allocation4], 1 }

</bundles_post_ra>
